<compile_context>
chip_gen: v5e
topology: v5e:2x2
jax: 0.10.0
libtpu: 0.0.40
codegen_flags: <defaults>
</compile_context>

<pallas_src>
import functools

import jax
import jax.numpy as jnp
from jax import lax
from jax.experimental import pallas as pl
from jax.experimental.pallas import tpu as pltpu


# ----------------------------------------------------------------------------
# helpers
# ----------------------------------------------------------------------------
def _round_up(x, m):
    return (x + m - 1) // m * m


def _pick_tile_k(mp, k, itemsize):
    """K tile: multiple of 128, sized so one F tile (double-buffered) stays
    well under the VMEM budget on every TPU generation (incl. v7x 64 MiB)."""
    k128 = _round_up(k, 128)
    per_buffer_budget = 4 * 1024 * 1024  # bytes per F tile; x2 for double-buffer
    tk = (per_buffer_budget // max(mp * itemsize, 1)) // 128 * 128
    tk = max(128, min(tk, k128))
    return tk


def _padded_features(x):
    """Flatten NCHW -> (a*b, c*d) and zero-pad to TPU-friendly (Mp, Kp)."""
    a, b, c, d = x.shape
    m, k = a * b, c * d
    feats = x.reshape(m, k)                       # keep native dtype (bf16 ok)
    mp = _round_up(m, 128)                        # lane-dense Gram output
    tk = _pick_tile_k(mp, k, feats.dtype.itemsize)
    kp = _round_up(k, tk)
    feats = jnp.pad(feats, ((0, mp - m), (0, kp - k)))
    return feats, m, k, mp, kp, tk


def _vmem_limit(mp, tk, itemsize):
    need = 2 * mp * tk * itemsize + 2 * mp * mp * 4
    return int(min(max(2 * need, 32 << 20), 48 << 20))


# ----------------------------------------------------------------------------
# kernels
# ----------------------------------------------------------------------------
def _gram_kernel(f_ref, gram_ref, *, inv_total):
    """Gram accumulation over K tiles; output block is resident across k."""
    k = pl.program_id(0)

    @pl.when(k == 0)
    def _():
        gram_ref[...] = jnp.zeros_like(gram_ref)

    f = f_ref[...]
    # F @ F^T without materializing a transpose: contract dim 1 of both sides.
    gram_ref[...] += lax.dot_general(
        f, f,
        dimension_numbers=(((1,), (1,)), ((), ())),
        preferred_element_type=jnp.float32,
    )

    @pl.when(k == pl.num_programs(0) - 1)
    def _():
        gram_ref[...] *= inv_total          # one-time finalize scale


def _style_loss_kernel(f_ref, tgt_ref, loss_ref, acc_ref, *, inv_total, inv_count):
    """Fused Gram + MSE vs target; only the scalar loss leaves the kernel."""
    k = pl.program_id(0)

    @pl.when(k == 0)
    def _():
        acc_ref[...] = jnp.zeros_like(acc_ref)

    f = f_ref[...]
    acc_ref[...] += lax.dot_general(
        f, f,
        dimension_numbers=(((1,), (1,)), ((), ())),
        preferred_element_type=jnp.float32,
    )

    @pl.when(k == pl.num_programs(0) - 1)
    def _():
        diff = acc_ref[...] * inv_total - tgt_ref[...]
        # Padded rows/cols are exactly zero in both grams -> diff == 0 there,
        # so sum over the padded (Mp, Mp) equals the true sum; divide by the
        # true element count m*m (PyTorch F.mse_loss, reduction='mean').
        loss_ref[0, 0] = jnp.sum(diff * diff) * inv_count


# ----------------------------------------------------------------------------
# wrappers
# ----------------------------------------------------------------------------
def _gram_padded(x):
    """Padded (Mp, Mp) Gram matrix of x, scaled by 1/(a*b*c*d)."""
    a, b, c, d = x.shape
    feats, m, k, mp, kp, tk = _padded_features(x)
    itemsize = feats.dtype.itemsize
    inv_total = 1.0 / float(a * b * c * d)

    gram = pl.pallas_call(
        functools.partial(_gram_kernel, inv_total=inv_total),
        out_shape=jax.ShapeDtypeStruct((mp, mp), jnp.float32),
        grid=(kp // tk,),
        in_specs=[pl.BlockSpec((mp, tk), lambda kk: (0, kk))],
        out_specs=pl.BlockSpec((mp, mp), lambda kk: (0, 0)),
        compiler_params=pltpu.CompilerParams(
            dimension_semantics=("arbitrary",),
            vmem_limit_bytes=_vmem_limit(mp, tk, itemsize),
        ),
        cost_estimate=pl.CostEstimate(
            flops=2 * mp * mp * kp,
            transcendentals=0,
            bytes_accessed=mp * kp * itemsize + mp * mp * 4,
        ),
    )(feats)
    return gram, m


def gram_matrix(x):
    """Pallas equivalent of StyleLoss.gram_matrix (returns (a*b, a*b) f32)."""
    gram, m = _gram_padded(x)
    return gram[:m, :m]


class StyleLoss:
    """JAX/Pallas port of the PyTorch StyleLoss module."""

    def __init__(self, target_feature):
        # Target gram is "detached": computed once as a concrete array.
        self._target_padded, self._m = _gram_padded(target_feature)
        self.target = self._target_padded[: self._m, : self._m]
        self.loss = None

    def __call__(self, x):
        a, b, c, d = x.shape
        feats, m, k, mp, kp, tk = _padded_features(x)
        assert mp == self._target_padded.shape[0], "batch*channels mismatch vs target"
        itemsize = feats.dtype.itemsize

        inv_total = 1.0 / float(a * b * c * d)
        inv_count = 1.0 / float(m * m)          # true MSE denominator (unpadded)

        loss = pl.pallas_call(
            functools.partial(
                _style_loss_kernel, inv_total=inv_total, inv_count=inv_count
            ),
            out_shape=jax.ShapeDtypeStruct((1, 1), jnp.float32),
            grid=(kp // tk,),
            in_specs=[
                pl.BlockSpec((mp, tk), lambda kk: (0, kk)),   # streamed F tiles
                pl.BlockSpec((mp, mp), lambda kk: (0, 0)),    # resident target gram
            ],
            out_specs=pl.BlockSpec(memory_space=pltpu.MemorySpace.SMEM),
            scratch_shapes=[pltpu.VMEM((mp, mp), jnp.float32)],
            compiler_params=pltpu.CompilerParams(
                dimension_semantics=("arbitrary",),
                vmem_limit_bytes=_vmem_limit(mp, tk, itemsize),
            ),
            cost_estimate=pl.CostEstimate(
                flops=2 * mp * mp * kp,
                transcendentals=0,
                bytes_accessed=mp * kp * itemsize + mp * mp * 4 + 4,
            ),
        )(feats, self._target_padded)

        self.loss = loss[0, 0]
        return x


# ----------------------------------------------------------------------------
# reference + self-test
# ----------------------------------------------------------------------------
def _reference_gram(x):
    a, b, c, d = x.shape
    f = x.reshape(a * b, c * d).astype(jnp.float32)
    return (f @ f.T) / (a * b * c * d)


if __name__ == "__main__":
    key = jax.random.PRNGKey(0)
    k_tgt, k_in = jax.random.split(key)

    # NCHW shapes consistent with a small conv feature map.
    target_feature = jax.random.normal(k_tgt, (2, 4, 16, 16), dtype=jnp.float32)
    x = jax.random.normal(k_in, (2, 4, 16, 16), dtype=jnp.float32)

    module = StyleLoss(target_feature)
    out = module(x)
    out = jax.block_until_ready(out)
    loss = jax.block_until_ready(module.loss)
    gram = jax.block_until_ready(gram_matrix(x))

    # Numerical check against a pure-JAX reference of the PyTorch semantics.
    ref_tgt = _reference_gram(target_feature)
    ref_gram = _reference_gram(x)
    ref_loss = jnp.mean((ref_gram - ref_tgt) ** 2)

    assert out.shape == x.shape and jnp.allclose(out, x), "forward must return input"
    assert jnp.allclose(module.target, ref_tgt, atol=1e-5, rtol=1e-5)
    assert jnp.allclose(gram, ref_gram, atol=1e-5, rtol=1e-5)
    assert jnp.allclose(loss, ref_loss, atol=1e-6, rtol=1e-5)

    print("KERNEL_OK")
</pallas_src>

<mosaic_0001>
module attributes {stable_mosaic.version = 11 : i64} {
  func.func @_gram_kernel(%arg0: i32, %arg1: memref<128x256xf32, #tpu.memory_space<vmem>>, %arg2: memref<128x128xf32, #tpu.memory_space<vmem>>) attributes {dimension_semantics = [#tpu.dimension_semantics<arbitrary>], iteration_bounds = array<i64: 1>, scalar_prefetch = 0 : i64, scratch_operands = 0 : i64, tpu.core_type = #tpu.core_type<tc>, window_params = [{transform_indices = @transform_0, window_bounds = array<i64: 128, 256>}, {pipeline_mode = #tpu.pipeline_mode<synchronous>, transform_indices = @transform_1, window_bounds = array<i64: 128, 128>}]} {
    %c0_i32 = arith.constant 0 : i32
    %0 = arith.cmpi eq, %arg0, %c0_i32 : i32
    %1 = arith.extui %0 : i1 to i32
    %c0_i32_0 = arith.constant 0 : i32
    %2 = arith.cmpi ne, %1, %c0_i32_0 : i32
    scf.if %2 {
      %cst_8 = arith.constant 0.000000e+00 : f32
      %11 = vector.broadcast %cst_8 : f32 to vector<128x128xf32>
      %c0_9 = arith.constant 0 : index
      %c0_10 = arith.constant 0 : index
      %12 = vector.load %arg2[%c0_9, %c0_10] : memref<128x128xf32, #tpu.memory_space<vmem>>, vector<128x128xf32>
      tpu.vector_store %arg2[%c0_9, %c0_10], %11 {strides = array<i32>} : memref<128x128xf32, #tpu.memory_space<vmem>>, vector<128x128xf32>,
    } else {
    }
    %c0 = arith.constant 0 : index
    %c0_1 = arith.constant 0 : index
    %3 = vector.load %arg1[%c0, %c0_1] : memref<128x256xf32, #tpu.memory_space<vmem>>, vector<128x256xf32>
    %c0_2 = arith.constant 0 : index
    %c0_3 = arith.constant 0 : index
    %4 = vector.load %arg2[%c0_2, %c0_3] : memref<128x128xf32, #tpu.memory_space<vmem>>, vector<128x128xf32>
    %cst = arith.constant dense<0.000000e+00> : vector<128x128xf32>
    %5 = tpu.matmul %3, %3, %cst {dimension_numbers = #tpu.dot_dimension_numbers<[1], [1], [0], [0], [0, 0, 1, 0], [], []>} : vector<128x256xf32>, vector<128x256xf32>, vector<128x128xf32> -> vector<128x128xf32>
    %6 = arith.addf %4, %5 : vector<128x128xf32>
    %c0_4 = arith.constant 0 : index
    %c0_5 = arith.constant 0 : index
    %7 = vector.load %arg2[%c0_4, %c0_5] : memref<128x128xf32, #tpu.memory_space<vmem>>, vector<128x128xf32>
    tpu.vector_store %arg2[%c0_4, %c0_5], %6 {strides = array<i32>} : memref<128x128xf32, #tpu.memory_space<vmem>>, vector<128x128xf32>,
    %c0_i32_6 = arith.constant 0 : i32
    %8 = arith.cmpi eq, %arg0, %c0_i32_6 : i32
    %9 = arith.extui %8 : i1 to i32
    %c0_i32_7 = arith.constant 0 : i32
    %10 = arith.cmpi ne, %9, %c0_i32_7 : i32
    scf.if %10 {
      %c0_8 = arith.constant 0 : index
      %c0_9 = arith.constant 0 : index
      %11 = vector.load %arg2[%c0_8, %c0_9] : memref<128x128xf32, #tpu.memory_space<vmem>>, vector<128x128xf32>
      %cst_10 = arith.constant 4.8828125E-4 : f32
      %12 = vector.broadcast %cst_10 : f32 to vector<128x128xf32>
      %13 = arith.mulf %11, %12 : vector<128x128xf32>
      %c0_11 = arith.constant 0 : index
      %c0_12 = arith.constant 0 : index
      %14 = vector.load %arg2[%c0_11, %c0_12] : memref<128x128xf32, #tpu.memory_space<vmem>>, vector<128x128xf32>
      tpu.vector_store %arg2[%c0_11, %c0_12], %13 {strides = array<i32>} : memref<128x128xf32, #tpu.memory_space<vmem>>, vector<128x128xf32>,
    } else {
    }
    return
  }
  func.func @transform_0(%arg0: i32) -> (i32, i32) {
    %c0_i32 = arith.constant 0 : i32
    %c0_i32_0 = arith.constant 0 : i32
    return %c0_i32, %arg0 : i32, i32
  }
  func.func @transform_1(%arg0: i32) -> (i32, i32) {
    %c0_i32 = arith.constant 0 : i32
    %c0_i32_0 = arith.constant 0 : i32
    %c0_i32_1 = arith.constant 0 : i32
    return %c0_i32, %c0_i32_0 : i32, i32
  }
}

</mosaic_0001>

<bundles_post_ra>
// kernel: tpu_custom_call.1
= control target key start
LH: loop header
LB: loop body
LE: loop exit
PB: predicated region body
PF: predicated region fallthrough
CT: control target
= control target key end

     0   :  { %6 = vsyncpa [#allocation3], 0  ;;  %s528_s0 = inlined_call_operand.hbm [shape: f32[128,256], index: 0, kind: input, shape index: {}]   ;;  %s529_s1 = inlined_call_operand.hbm [shape: f32[128,128], index: 1, kind: output, shape index: {}]  }
   0x1   :  { %7 = vsyncpa [#allocation4], 0  ;;  %s12_s8 = sshll.u32 %s528_s0, 4  ;;  %s416_s9 = smov [#allocation2]   ;;  %s13_s8 = int_to_ptr.hbm [resolvable:$true] %s12_s8 }
   0x2   :  { %s14_s10 = sshll.u32 %s416_s9, 4  ;;  %s417_s11 = smov 256   ;;  %s15_s10 = int_to_ptr.vmem [resolvable:$true] %s14_s10 }
   0x3   :  { %s418_s12 = smov 16  }
   0x4   :  { %20 = dma.hbm_to_vmem [thread:$0]  %s13_s8, 4096, %s15_s10, [#allocation3], %s417_s11, %s417_s11, %s418_s12  }
   0x5   :  { %412 = dma.done.wait [#allocation3], 4096  }
   0x6   :  { %413 = vsyncadd [#allocation3], 4294963200  ;;  %v435_v0 = vld [vmem:[#allocation2 + $0xf0] sm:$0xff]  ;;  %v437_v1 = vld [vmem:[#allocation2 + $0xf8] sm:$0xff]  ;;  %s419_s0 = smov [#allocation5]   ;;  %s312_s16 = sshll.u32 %s529_s1, 4  ;;  %s313_s16 = int_to_ptr.hbm [resolvable:$true] %s312_s16 }
   0x7   :  { %325 = vmatpush.xpose.msra.mxu2 %v435_v0  ;;  %341 = vmatpush.xpose.msra.mxu3 %v437_v1  ;;  %v441_v2 = vld [vmem:[#allocation2 + $0xe0] sm:$0xff]  ;;  %v443_v3 = vld [vmem:[#allocation2 + $0xe8] sm:$0xff]  ;;  %v449_v4 = vld [vmem:[#allocation2 + $0xd0] sm:$0xff]  ;;  %s310_s13 = sshll.u32 %s419_s0, 4  ;;  %s420_s17 = smov 128   ;;  %s311_s13 = int_to_ptr.vmem [resolvable:$true] %s310_s13 }
   0x8   :  { %93 = vmatpush.xpose.msra.mxu0 %v435_v0  ;;  %158 = vmatpush.xpose.msra.mxu1 %v437_v1  ;;  %v451_v5 = vld [vmem:[#allocation2 + $0xd8] sm:$0xff]  ;;  %v457_v6 = vld [vmem:[#allocation2 + $0xc0] sm:$0xff]  ;;  %v459_v7 = vld [vmem:[#allocation2 + $0xc8] sm:$0xff]  ;;  %s421_s18 = smov 8  }
   0x9   :  { %v465_v8 = vld [vmem:[#allocation2 + $0xb0] sm:$0xff]  ;;  %v467_v9 = vld [vmem:[#allocation2 + $0xb8] sm:$0xff]  ;;  %v473_v10 = vld [vmem:[#allocation2 + $0xa0] sm:$0xff] }
   0xa   :  { %v475_v11 = vld [vmem:[#allocation2 + $0xa8] sm:$0xff]  ;;  %v481_v12 = vld [vmem:[#allocation2 + $0x90] sm:$0xff]  ;;  %v483_v13 = vld [vmem:[#allocation2 + $0x98] sm:$0xff] }
   0xb   :  { %326 = vmatpush.xpose.msra.mxu2 %v441_v2  ;;  %342 = vmatpush.xpose.msra.mxu3 %v443_v3  ;;  %v61_v14 = vld [vmem:[#allocation2 + $0x80] sm:$0xff]  ;;  %v62_v15 = vld [vmem:[#allocation2 + $0x88] sm:$0xff]  ;;  %v491_v16 = vld [vmem:[#allocation2 + $0x70] sm:$0xff] }
   0xc   :  { %94 = vmatpush.xpose.msra.mxu0 %v441_v2  ;;  %159 = vmatpush.xpose.msra.mxu1 %v443_v3  ;;  %v493_v17 = vld [vmem:[#allocation2 + $0x78] sm:$0xff]  ;;  %v497_v18 = vld [vmem:[#allocation2 + $0x60] sm:$0xff]  ;;  %v499_v19 = vld [vmem:[#allocation2 + $0x68] sm:$0xff] }
   0xd   :  { %v55_v20 = vld [vmem:[#allocation2 + $0x50] sm:$0xff]  ;;  %v56_v21 = vld [vmem:[#allocation2 + $0x58] sm:$0xff]  ;;  %v53_v22 = vld [vmem:[#allocation2 + $0x40] sm:$0xff] }
   0xe   :  { %v54_v23 = vld [vmem:[#allocation2 + $0x48] sm:$0xff]  ;;  %v51_v24 = vld [vmem:[#allocation2 + $0x30] sm:$0xff]  ;;  %v52_v25 = vld [vmem:[#allocation2 + $0x38] sm:$0xff] }
   0xf   :  { %327 = vmatpush.xpose.msra.mxu2 %v449_v4  ;;  %343 = vmatpush.xpose.msra.mxu3 %v451_v5  ;;  %v49_v26 = vld [vmem:[#allocation2 + $0x20] sm:$0xff]  ;;  %v50_v27 = vld [vmem:[#allocation2 + $0x28] sm:$0xff]  ;;  %v47_v28 = vld [vmem:[#allocation2 + $0x10] sm:$0xff] }
  0x10   :  { %95 = vmatpush.xpose.msra.mxu0 %v449_v4  ;;  %160 = vmatpush.xpose.msra.mxu1 %v451_v5  ;;  %v48_v29 = vld [vmem:[#allocation2 + $0x18] sm:$0xff]  ;;  %v45_v30 = vld [vmem:[#allocation2] sm:$0xff]  ;;  %v46_v31 = vld [vmem:[#allocation2 + $0x8] sm:$0xff] }
  0x13   :  { %328 = vmatpush.xpose.msra.mxu2 %v457_v6  ;;  %344 = vmatpush.xpose.msra.mxu3 %v459_v7 }
  0x14   :  { %96 = vmatpush.xpose.msra.mxu0 %v457_v6  ;;  %161 = vmatpush.xpose.msra.mxu1 %v459_v7 }
  0x17   :  { %329 = vmatpush.xpose.msra.mxu2 %v465_v8  ;;  %345 = vmatpush.xpose.msra.mxu3 %v467_v9 }
  0x18   :  { %97 = vmatpush.xpose.msra.mxu0 %v465_v8  ;;  %162 = vmatpush.xpose.msra.mxu1 %v467_v9 }
  0x1b   :  { %330 = vmatpush.xpose.msra.mxu2 %v473_v10  ;;  %346 = vmatpush.xpose.msra.mxu3 %v475_v11 }
  0x1c   :  { %98 = vmatpush.xpose.msra.mxu0 %v473_v10  ;;  %163 = vmatpush.xpose.msra.mxu1 %v475_v11 }
  0x1f   :  { %331 = vmatpush.xpose.msra.mxu2 %v481_v12  ;;  %347 = vmatpush.xpose.msra.mxu3 %v483_v13 }
  0x20   :  { %99 = vmatpush.xpose.msra.mxu0 %v481_v12  ;;  %164 = vmatpush.xpose.msra.mxu1 %v483_v13 }
  0x23   :  { %332 = vmatpush.xpose.msra.mxu2 %v61_v14  ;;  %348 = vmatpush.xpose.msra.mxu3 %v62_v15 }
  0x24   :  { %100 = vmatpush.xpose.msra.mxu0 %v61_v14  ;;  %165 = vmatpush.xpose.msra.mxu1 %v62_v15 }
  0x27   :  { %333 = vmatpush.xpose.msra.mxu2 %v491_v16  ;;  %349 = vmatpush.xpose.msra.mxu3 %v493_v17 }
  0x28   :  { %101 = vmatpush.xpose.msra.mxu0 %v491_v16  ;;  %166 = vmatpush.xpose.msra.mxu1 %v493_v17 }
  0x2b   :  { %334 = vmatpush.xpose.msra.mxu2 %v497_v18  ;;  %350 = vmatpush.xpose.msra.mxu3 %v499_v19 }
  0x2c   :  { %102 = vmatpush.xpose.msra.mxu0 %v497_v18  ;;  %167 = vmatpush.xpose.msra.mxu1 %v499_v19 }
  0x2f   :  { %335 = vmatpush.xpose.msra.mxu2 %v55_v20  ;;  %351 = vmatpush.xpose.msra.mxu3 %v56_v21 }
  0x30   :  { %103 = vmatpush.xpose.msra.mxu0 %v55_v20  ;;  %168 = vmatpush.xpose.msra.mxu1 %v56_v21 }
  0x33   :  { %336 = vmatpush.xpose.msra.mxu2 %v53_v22  ;;  %352 = vmatpush.xpose.msra.mxu3 %v54_v23 }
  0x34   :  { %104 = vmatpush.xpose.msra.mxu0 %v53_v22  ;;  %169 = vmatpush.xpose.msra.mxu1 %v54_v23 }
  0x37   :  { %337 = vmatpush.xpose.msra.mxu2 %v51_v24  ;;  %353 = vmatpush.xpose.msra.mxu3 %v52_v25 }
  0x38   :  { %105 = vmatpush.xpose.msra.mxu0 %v51_v24  ;;  %170 = vmatpush.xpose.msra.mxu1 %v52_v25 }
  0x3b   :  { %338 = vmatpush.xpose.msra.mxu2 %v49_v26  ;;  %354 = vmatpush.xpose.msra.mxu3 %v50_v27 }
  0x3c   :  { %106 = vmatpush.xpose.msra.mxu0 %v49_v26  ;;  %171 = vmatpush.xpose.msra.mxu1 %v50_v27 }
  0x3f   :  { %339 = vmatpush.xpose.msra.mxu2 %v47_v28  ;;  %355 = vmatpush.xpose.msra.mxu3 %v48_v29 }
  0x40   :  { %107 = vmatpush.xpose.msra.mxu0 %v47_v28  ;;  %172 = vmatpush.xpose.msra.mxu1 %v48_v29 }
  0x43   :  { %340 = vmatpush.xpose.msra.mxu2 %v45_v30  ;;  %356 = vmatpush.xpose.msra.mxu3 %v46_v31 }
  0x44   :  { %108 = vmatpush.xpose.msra.mxu0 %v45_v30  ;;  %173 = vmatpush.xpose.msra.mxu1 %v46_v31 }
  0x46   :  { %133 = vmatmul.f32.vlgmr.msra.gmra.mxu2 %v61_v14  ;;  %198 = vmatmul.f32.vlgmr.msra.gmra.mxu3 %v62_v15 }
  0x47   :  { %109 = vmatmul.f32.vlgmr.msra.gmra.mxu0 %v45_v30  ;;  %174 = vmatmul.f32.vlgmr.msra.gmra.mxu1 %v46_v31 }
  0x4e   :  { %136 = vmatmul.f32.gmra.mxu2 %v481_v12  ;;  %201 = vmatmul.f32.gmra.mxu3 %v483_v13 }
  0x4f   :  { %112 = vmatmul.f32.gmra.mxu0 %v47_v28  ;;  %177 = vmatmul.f32.gmra.mxu1 %v48_v29 }
  0x56   :  { %139 = vmatmul.f32.gmra.mxu2 %v473_v10  ;;  %204 = vmatmul.f32.gmra.mxu3 %v475_v11 }
  0x57   :  { %115 = vmatmul.f32.gmra.mxu0 %v49_v26  ;;  %180 = vmatmul.f32.gmra.mxu1 %v50_v27 }
  0x5e   :  { %142 = vmatmul.f32.gmra.mxu2 %v465_v8  ;;  %207 = vmatmul.f32.gmra.mxu3 %v467_v9 }
  0x5f   :  { %118 = vmatmul.f32.gmra.mxu0 %v51_v24  ;;  %183 = vmatmul.f32.gmra.mxu1 %v52_v25 }
  0x66   :  { %145 = vmatmul.f32.gmra.mxu2 %v457_v6  ;;  %210 = vmatmul.f32.gmra.mxu3 %v459_v7 }
  0x67   :  { %121 = vmatmul.f32.gmra.mxu0 %v53_v22  ;;  %186 = vmatmul.f32.gmra.mxu1 %v54_v23 }
  0x6e   :  { %148 = vmatmul.f32.gmra.mxu2 %v449_v4  ;;  %213 = vmatmul.f32.gmra.mxu3 %v451_v5 }
  0x6f   :  { %124 = vmatmul.f32.gmra.mxu0 %v55_v20  ;;  %189 = vmatmul.f32.gmra.mxu1 %v56_v21 }
  0x76   :  { %151 = vmatmul.f32.gmra.mxu2 %v441_v2  ;;  %216 = vmatmul.f32.gmra.mxu3 %v443_v3 }
  0x77   :  { %127 = vmatmul.f32.gmra.mxu0 %v497_v18  ;;  %192 = vmatmul.f32.gmra.mxu1 %v499_v19 }
  0x7e   :  { %154 = vmatmul.f32.gmra.mxu2 %v435_v0  ;;  %219 = vmatmul.f32.gmra.mxu3 %v437_v1 }
  0x7f   :  { %130 = vmatmul.f32.gmra.mxu0 %v491_v16  ;;  %195 = vmatmul.f32.gmra.mxu1 %v493_v17 }
  0xc4   :  { %v110_v32 = vpop.f32.mrf.mxu0  ;;  %v175_v33 = vpop.f32.mrf.mxu1 }
  0xc5   :  { %v176_v34 = vadd.f32 %v175_v33, %v110_v32 }
  0xc7   :  { %v274_v36 = vmul.f32 0.00048828125, %v176_v34 }
  0xc9   :  { %v134_v35 = vpop.f32.mrf.mxu2  ;;  %v199_v37 = vpop.f32.mrf.mxu3  ;;  %290 = vst [vmem:[#allocation5] sm:$0xff] %v274_v36 }
  0xca   :  { %v200_v38 = vadd.f32 %v199_v37, %v134_v35 }
  0xcc   :  { %v113_v39 = vpop.f32.mrf.mxu0  ;;  %v178_v40 = vpop.f32.mrf.mxu1  ;;  %v282_v42 = vmul.f32 0.00048828125, %v200_v38 }
  0xcd   :  { %v179_v41 = vadd.f32 %v178_v40, %v113_v39 }
  0xce   :  { %298 = vst [vmem:[#allocation5 + $0x40] sm:$0xff] %v282_v42 }
  0xcf   :  { %v275_v44 = vmul.f32 0.00048828125, %v179_v41 }
  0xd1   :  { %v137_v43 = vpop.f32.mrf.mxu2  ;;  %v202_v45 = vpop.f32.mrf.mxu3  ;;  %291 = vst [vmem:[#allocation5 + $0x8] sm:$0xff] %v275_v44 }
  0xd2   :  { %v203_v46 = vadd.f32 %v202_v45, %v137_v43 }
  0xd4   :  { %v116_v47 = vpop.f32.mrf.mxu0  ;;  %v181_v48 = vpop.f32.mrf.mxu1  ;;  %v283_v50 = vmul.f32 0.00048828125, %v203_v46 }
  0xd5   :  { %v182_v49 = vadd.f32 %v181_v48, %v116_v47 }
  0xd6   :  { %299 = vst [vmem:[#allocation5 + $0x48] sm:$0xff] %v283_v50 }
  0xd7   :  { %v276_v52 = vmul.f32 0.00048828125, %v182_v49 }
  0xd9   :  { %v140_v51 = vpop.f32.mrf.mxu2  ;;  %v205_v53 = vpop.f32.mrf.mxu3  ;;  %292 = vst [vmem:[#allocation5 + $0x10] sm:$0xff] %v276_v52 }
  0xda   :  { %v206_v54 = vadd.f32 %v205_v53, %v140_v51 }
  0xdc   :  { %v119_v55 = vpop.f32.mrf.mxu0  ;;  %v184_v56 = vpop.f32.mrf.mxu1  ;;  %v284_v58 = vmul.f32 0.00048828125, %v206_v54 }
  0xdd   :  { %v185_v57 = vadd.f32 %v184_v56, %v119_v55 }
  0xde   :  { %300 = vst [vmem:[#allocation5 + $0x50] sm:$0xff] %v284_v58 }
  0xdf   :  { %v277_v60 = vmul.f32 0.00048828125, %v185_v57 }
  0xe1   :  { %v143_v59 = vpop.f32.mrf.mxu2  ;;  %v208_v61 = vpop.f32.mrf.mxu3  ;;  %293 = vst [vmem:[#allocation5 + $0x18] sm:$0xff] %v277_v60 }
  0xe2   :  { %v209_v62 = vadd.f32 %v208_v61, %v143_v59 }
  0xe4   :  { %v122_v63 = vpop.f32.mrf.mxu0  ;;  %v187_v0 = vpop.f32.mrf.mxu1  ;;  %v285_v2 = vmul.f32 0.00048828125, %v209_v62 }
  0xe5   :  { %v188_v1 = vadd.f32 %v187_v0, %v122_v63 }
  0xe6   :  { %301 = vst [vmem:[#allocation5 + $0x58] sm:$0xff] %v285_v2 }
  0xe7   :  { %v278_v4 = vmul.f32 0.00048828125, %v188_v1 }
  0xe9   :  { %v146_v3 = vpop.f32.mrf.mxu2  ;;  %v211_v5 = vpop.f32.mrf.mxu3  ;;  %294 = vst [vmem:[#allocation5 + $0x20] sm:$0xff] %v278_v4 }
  0xea   :  { %v212_v6 = vadd.f32 %v211_v5, %v146_v3 }
  0xec   :  { %v125_v7 = vpop.f32.mrf.mxu0  ;;  %v190_v8 = vpop.f32.mrf.mxu1  ;;  %v286_v10 = vmul.f32 0.00048828125, %v212_v6 }
  0xed   :  { %v191_v9 = vadd.f32 %v190_v8, %v125_v7 }
  0xee   :  { %302 = vst [vmem:[#allocation5 + $0x60] sm:$0xff] %v286_v10 }
  0xef   :  { %v279_v12 = vmul.f32 0.00048828125, %v191_v9 }
  0xf1   :  { %v149_v11 = vpop.f32.mrf.mxu2  ;;  %v214_v13 = vpop.f32.mrf.mxu3  ;;  %295 = vst [vmem:[#allocation5 + $0x28] sm:$0xff] %v279_v12 }
  0xf2   :  { %v215_v14 = vadd.f32 %v214_v13, %v149_v11 }
  0xf4   :  { %v128_v15 = vpop.f32.mrf.mxu0  ;;  %v193_v16 = vpop.f32.mrf.mxu1  ;;  %v287_v18 = vmul.f32 0.00048828125, %v215_v14 }
  0xf5   :  { %v194_v17 = vadd.f32 %v193_v16, %v128_v15 }
  0xf6   :  { %303 = vst [vmem:[#allocation5 + $0x68] sm:$0xff] %v287_v18 }
  0xf7   :  { %v280_v20 = vmul.f32 0.00048828125, %v194_v17 }
  0xf9   :  { %v152_v19 = vpop.f32.mrf.mxu2  ;;  %v217_v21 = vpop.f32.mrf.mxu3  ;;  %296 = vst [vmem:[#allocation5 + $0x30] sm:$0xff] %v280_v20 }
  0xfa   :  { %v218_v22 = vadd.f32 %v217_v21, %v152_v19 }
  0xfc   :  { %v131_v23 = vpop.f32.mrf.mxu0  ;;  %v196_v24 = vpop.f32.mrf.mxu1  ;;  %v288_v26 = vmul.f32 0.00048828125, %v218_v22 }
  0xfd   :  { %v197_v25 = vadd.f32 %v196_v24, %v131_v23 }
  0xfe   :  { %304 = vst [vmem:[#allocation5 + $0x70] sm:$0xff] %v288_v26 }
  0xff   :  { %v281_v28 = vmul.f32 0.00048828125, %v197_v25 }
 0x101   :  { %v155_v27 = vpop.f32.mrf.mxu2  ;;  %v220_v29 = vpop.f32.mrf.mxu3  ;;  %297 = vst [vmem:[#allocation5 + $0x38] sm:$0xff] %v281_v28 }
 0x102   :  { %v221_v30 = vadd.f32 %v220_v29, %v155_v27 }
 0x104   :  { %v289_v31 = vmul.f32 0.00048828125, %v221_v30 }
 0x106   :  { %305 = vst [vmem:[#allocation5 + $0x78] sm:$0xff] %v289_v31 }
 0x107   :  { %318 = dma.vmem_to_hbm [thread:$0]  %s311_s13, 2048, %s313_s16, [#allocation4], %s420_s17, %s420_s17, %s421_s18  }
 0x108   :  { %414 = dma.done.wait [#allocation4], 2048  }
 0x109   :  { %415 = vsyncadd [#allocation4], 4294965248 }
 0x10a   :  { %323 = vsyncpa [#allocation3], 1 }
 0x10b   :  { %324 = vsyncpa [#allocation4], 1 }

</bundles_post_ra>
